<compile_context>
chip_gen: v6e
topology: v6e:2x2x1
jax: 0.10.0
libtpu: 0.0.40
codegen_flags: <defaults>
</compile_context>

<pallas_src>
import functools

import jax
import jax.numpy as jnp
from jax.experimental import pallas as pl
from jax.experimental.pallas import tpu as pltpu

_LANE = 128
_SUBLANE = 8


def _round_up(x, m):
    return (x + m - 1) // m * m


def _cdiv(a, b):
    return -(-a // b)


def _chip_defaults():
    """(tile_rows, n_splits, vmem_limit_bytes) per TPU generation."""
    kind = ""
    try:
        kind = jax.devices()[0].device_kind.lower()
    except Exception:
        pass
    if "v7" in kind or "tpu7" in kind:
        # 2 TCs @ ~3.2 TB/s each, 64 MiB physical VMEM: big blocks + split across TCs.
        # 3 inputs x 2 buffers x 8192x128 f32 = 24 MiB of pipeline buffers.
        return 8192, 2, 48 << 20
    if "v6" in kind:
        # 1 TC @ ~1.3-1.4 TB/s, 128 MiB VMEM: big blocks, no split axis needed.
        return 8192, 1, 64 << 20
    if "v5" in kind:
        # 1 TC @ ~0.8 TB/s, 128 MiB VMEM but 16 MiB *scoped* default: keep the 4096-row
        # block and raise the scoped limit instead of regressing to smaller tiles.
        return 4096, 1, 64 << 20
    return 4096, 1, 64 << 20


def _bce_kernel(true_ref, pred_ref, score_ref, acc_ref, *, rows, tile_rows,
                chunk_rows, blocks_per_split, needs_mask, first_masked_block):
    """Accumulate sum(score * bce_with_logits(pred, true)) of this block into acc_ref."""
    # acc_ref: (8, 128) f32 partial-sum block for this split; resident in VMEM across the
    # whole "arbitrary" (reduction) grid axis.
    @pl.when(pl.program_id(1) == 0)
    def _init():
        acc_ref[...] = jnp.zeros_like(acc_ref)

    blk = pl.program_id(0) * blocks_per_split + pl.program_id(1)  # logical block index
    n_chunks = tile_rows // chunk_rows
    groups = chunk_rows // _SUBLANE

    def accumulate(masked):
        # Fully-unrolled sub-chunk loop (n_chunks <= 8 with default tiles): bounds the f32
        # elementwise temporaries to (chunk_rows, 128) instead of (tile_rows, 128), so VMEM
        # stays available for the big double-buffered pipeline blocks.
        for c in range(n_chunks):
            r0 = c * chunk_rows  # static, chunk_rows-aligned
            x = pred_ref[pl.ds(r0, chunk_rows), :].astype(jnp.float32)   # logits
            z = true_ref[pl.ds(r0, chunk_rows), :].astype(jnp.float32)   # targets
            w = score_ref[pl.ds(r0, chunk_rows), :].astype(jnp.float32)  # weights
            # Numerically stable BCE-with-logits (same formula PyTorch uses):
            #   max(x, 0) - x*z + log1p(exp(-|x|))
            per_elem = jnp.maximum(x, 0.0) - x * z + jnp.log1p(jnp.exp(-jnp.abs(x)))
            v = w * per_elem
            if masked:
                # Rows past the end of the (flattened) input come from grid-coverage
                # overshoot (partial / clamped-duplicate last blocks) and hold undefined
                # data that may have become NaN/Inf above.  A select (NOT a multiply by
                # zero) is required so garbage is discarded, never propagated.
                r_ids = jax.lax.broadcasted_iota(jnp.int32, v.shape, 0)
                keep = blk * tile_rows + r0 + r_ids < rows
                v = jnp.where(keep, v, 0.0)
            # Deferred reduction: fold the chunk onto the 8-sublane accumulator with pure
            # VPU adds (no per-step cross-lane XLU reduce, no (1,1) read-modify-write).
            acc_ref[...] += v.reshape(groups, _SUBLANE, _LANE).sum(axis=0)

    if needs_mask:
        if first_masked_block > 0:
            # Mask-free fast path for all fully in-bounds blocks (saves ~3 VALU
            # ops/element; matters on v7x where VALU is already busy at 12 B/elem).
            @pl.when(blk < first_masked_block)
            def _full():
                accumulate(False)

            @pl.when(blk >= first_masked_block)
            def _edge():
                accumulate(True)
        else:
            accumulate(True)
    else:
        accumulate(False)


def weighted_bce_with_logits_mean(true, pred, score, *, tile_rows=None, n_splits=None,
                                  vmem_limit_bytes=None, core_parallel=False):
    """Pallas equivalent of criterion()(true, pred, score) for same-shaped inputs."""
    assert true.shape == pred.shape == score.shape, "true/pred/score must share a shape"
    n_elem = int(pred.size)
    assert n_elem > 0

    dflt_tile, dflt_splits, dflt_vmem = _chip_defaults()
    if tile_rows is None:
        tile_rows = dflt_tile
    if n_splits is None:
        n_splits = dflt_splits
    if vmem_limit_bytes is None:
        vmem_limit_bytes = dflt_vmem
    n_splits = max(1, int(n_splits))

    def prep(a):
        # Stream in native dtype: the in-kernel cast is free, a wrapper-side astype costs
        # a full HBM read+write pass.  Bools are the one exception (BCEWithLogitsLoss
        # targets are float anyway).
        if a.dtype == jnp.bool_:
            a = a.astype(jnp.float32)
        return a.reshape(-1)

    t, p, s = prep(true), prep(pred), prep(score)

    # Sublane packing of the narrowest streamed dtype (f32 -> 8, bf16 -> 16, int8 -> 32);
    # every block/chunk row count is kept a multiple of this.
    min_item = min(int(jnp.dtype(a.dtype).itemsize) for a in (t, p, s))
    sub = _SUBLANE * max(1, 4 // min_item)

    # Lane-dense (rows, 128) view.  In the aligned case (typical image tensors, incl. the
    # demo) this is a free reshape - no pad, no copy.  Only ragged flat lengths get
    # zero-padded; padded elements have score == 0 so they contribute nothing (invariant:
    # the pad value must stay exactly 0).
    # TODO(synk): replace the ragged-tail pad with an in-kernel lane mask on the last row
    # to avoid the extra full HBM read+write pass for misaligned sizes.
    aligned_len = _round_up(n_elem, sub * _LANE)
    if aligned_len != n_elem:
        padn = aligned_len - n_elem
        t = jnp.pad(t, (0, padn))
        p = jnp.pad(p, (0, padn))
        s = jnp.pad(s, (0, padn))
    rows = aligned_len // _LANE

    t = t.reshape(rows, _LANE)
    p = p.reshape(rows, _LANE)
    s = s.reshape(rows, _LANE)

    # --- Tile sizing -----------------------------------------------------------------
    tile_rows = max(sub, _round_up(int(tile_rows), sub))
    rows_per_split = _cdiv(rows, n_splits)
    if rows_per_split < tile_rows:
        # Whole per-split problem fits a single block.  `rows` is a multiple of `sub`, so
        # tile_rows <= rows and every pipelined DMA start/extent stays inside the array.
        tile_rows = _round_up(rows_per_split, sub)
    # Sub-chunk size for the in-kernel accumulation loop.
    chunk_rows = tile_rows
    for cand in (1024, 512, 256, 128):
        c = _round_up(cand, sub)
        if tile_rows % c == 0:
            chunk_rows = c
            break

    total_blocks = _cdiv(rows, tile_rows)
    blocks_per_split = _cdiv(total_blocks, n_splits)
    coverage = n_splits * blocks_per_split * tile_rows
    needs_mask = coverage != rows
    clamp_blocks = n_splits * blocks_per_split > total_blocks
    first_masked_block = rows // tile_rows
    last_block = total_blocks - 1

    if clamp_blocks:
        # Keep every DMA start in-bounds: surplus grid steps re-read the last valid block
        # and are fully masked to zero inside the kernel.
        def in_index(i, j):
            return (jnp.minimum(i * blocks_per_split + j, last_block), 0)
    else:
        def in_index(i, j):
            return (i * blocks_per_split + j, 0)

    # Default double-buffering.  Only sweep pipeline_mode=pl.Buffered(3) here if a trace
    # shows exposed DMA at step boundaries (it costs +1 block of VMEM per input).
    in_specs = [pl.BlockSpec((tile_rows, _LANE), in_index) for _ in range(3)]

    kernel = functools.partial(
        _bce_kernel, rows=rows, tile_rows=tile_rows, chunk_rows=chunk_rows,
        blocks_per_split=blocks_per_split, needs_mask=needs_mask,
        first_masked_block=first_masked_block)

    # Split axis: "parallel" (megacore sharding; trivial size-1 axis on v5e/v6e).  On v7x,
    # if a trace shows both TensorCores are NOT engaged, pass core_parallel=True to force
    # CORE_PARALLEL semantics on that axis.
    split_sem = pltpu.CORE_PARALLEL if core_parallel else pltpu.PARALLEL

    in_bytes = sum(int(a.size) * int(jnp.dtype(a.dtype).itemsize) for a in (t, p, s))

    partials = pl.pallas_call(
        kernel,
        out_shape=jax.ShapeDtypeStruct((n_splits, _SUBLANE, _LANE), jnp.float32),
        grid_spec=pltpu.PrefetchScalarGridSpec(
            num_scalar_prefetch=0,
            grid=(n_splits, blocks_per_split),
            in_specs=in_specs,
            out_specs=pl.BlockSpec((None, _SUBLANE, _LANE), lambda i, j: (i, 0, 0)),
        ),
        compiler_params=pltpu.CompilerParams(
            # split axis: parallel; row-block axis: accumulating reduction.
            dimension_semantics=(split_sem, pltpu.ARBITRARY),
            vmem_limit_bytes=int(vmem_limit_bytes),
        ),
        cost_estimate=pl.CostEstimate(
            flops=6 * n_elem,
            transcendentals=2 * n_elem,
            bytes_accessed=in_bytes + n_splits * _SUBLANE * _LANE * 4,
        ),
    )(t, p, s)

    # 'mean' reduction: divide by the true total element count (not sum(score)).
    return jnp.sum(partials) / jnp.float32(n_elem)


def _reference(true, pred, score):
    t = true.astype(jnp.float32)
    p = pred.astype(jnp.float32)
    s = score.astype(jnp.float32)
    per_elem = jnp.maximum(p, 0.0) - p * t + jnp.log1p(jnp.exp(-jnp.abs(p)))
    return jnp.mean(s * per_elem)


if __name__ == "__main__":
    key = jax.random.PRNGKey(0)
    k1, k2, k3 = jax.random.split(key, 3)

    # Small shapes consistent with the training script: (batch, channels, H, W).
    B, C, H, W = 2, 4, 16, 16
    pred = jax.random.normal(k1, (B, C, H, W), dtype=jnp.float32)              # logits
    true = (jax.random.uniform(k2, (B, C, H, W)) > 0.5).astype(jnp.float32)    # {0,1}
    score = jax.random.uniform(k3, (B, C, H, W), dtype=jnp.float32)            # weights

    out = weighted_bce_with_logits_mean(true, pred, score)
    out = jax.block_until_ready(out)

    ref = _reference(true, pred, score)
    assert jnp.allclose(out, ref, rtol=1e-5, atol=1e-5), (out, ref)

    print("KERNEL_OK")
</pallas_src>

<mosaic_0001>
module attributes {stable_mosaic.version = 11 : i64} {
  func.func @_bce_kernel(%arg0: i32, %arg1: i32, %arg2: memref<16x128xf32, #tpu.memory_space<vmem>>, %arg3: memref<16x128xf32, #tpu.memory_space<vmem>>, %arg4: memref<16x128xf32, #tpu.memory_space<vmem>>, %arg5: memref<1x8x128xf32, #tpu.memory_space<vmem>>) attributes {dimension_semantics = [#tpu.dimension_semantics<parallel>, #tpu.dimension_semantics<arbitrary>], iteration_bounds = array<i64: 1, 1>, scalar_prefetch = 0 : i64, scratch_operands = 0 : i64, tpu.core_type = #tpu.core_type<tc>, window_params = [{transform_indices = @transform_0, window_bounds = array<i64: 16, 128>}, {transform_indices = @transform_1, window_bounds = array<i64: 16, 128>}, {transform_indices = @transform_2, window_bounds = array<i64: 16, 128>}, {transform_indices = @transform_3, window_bounds = array<i64: 1, 8, 128>}]} {
    %c0_i32 = arith.constant 0 : i32
    %0 = arith.cmpi eq, %arg1, %c0_i32 : i32
    %1 = arith.extui %0 : i1 to i32
    %c0_i32_0 = arith.constant 0 : i32
    %2 = arith.cmpi ne, %1, %c0_i32_0 : i32
    scf.if %2 {
      %cst_14 = arith.constant 0.000000e+00 : f32
      %25 = vector.broadcast %cst_14 : f32 to vector<8x128xf32>
      %c0_15 = arith.constant 0 : index
      %c0_16 = arith.constant 0 : index
      %c0_17 = arith.constant 0 : index
      %26 = vector.load %arg5[%c0_15, %c0_16, %c0_17] : memref<1x8x128xf32, #tpu.memory_space<vmem>>, vector<1x8x128xf32>
      %27 = vector.shape_cast %26 : vector<1x8x128xf32> to vector<8x128xf32>
      %28 = vector.shape_cast %25 : vector<8x128xf32> to vector<1x8x128xf32>
      tpu.vector_store %arg5[%c0_15, %c0_16, %c0_17], %28 {strides = array<i32>} : memref<1x8x128xf32, #tpu.memory_space<vmem>>, vector<1x8x128xf32>,
    } else {
    }
    %c0 = arith.constant 0 : index
    %c0_1 = arith.constant 0 : index
    %3 = vector.load %arg3[%c0, %c0_1] : memref<16x128xf32, #tpu.memory_space<vmem>>, vector<16x128xf32>
    %c0_2 = arith.constant 0 : index
    %c0_3 = arith.constant 0 : index
    %4 = vector.load %arg2[%c0_2, %c0_3] : memref<16x128xf32, #tpu.memory_space<vmem>>, vector<16x128xf32>
    %c0_4 = arith.constant 0 : index
    %c0_5 = arith.constant 0 : index
    %5 = vector.load %arg4[%c0_4, %c0_5] : memref<16x128xf32, #tpu.memory_space<vmem>>, vector<16x128xf32>
    %cst = arith.constant 0.000000e+00 : f32
    %6 = vector.broadcast %cst : f32 to vector<16x128xf32>
    %7 = arith.maximumf %3, %6 : vector<16x128xf32>
    %8 = arith.mulf %3, %4 : vector<16x128xf32>
    %9 = arith.subf %7, %8 : vector<16x128xf32>
    %10 = math.absf %3 : vector<16x128xf32>
    %cst_6 = arith.constant 0.000000e+00 : f32
    %11 = vector.broadcast %cst_6 : f32 to vector<16x128xf32>
    %12 = arith.subf %11, %10 : vector<16x128xf32>
    %13 = math.exp %12 : vector<16x128xf32>
    %14 = math.log1p %13 : vector<16x128xf32>
    %15 = arith.addf %9, %14 : vector<16x128xf32>
    %16 = arith.mulf %5, %15 : vector<16x128xf32>
    %c0_7 = arith.constant 0 : index
    %c0_8 = arith.constant 0 : index
    %c0_9 = arith.constant 0 : index
    %17 = vector.load %arg5[%c0_7, %c0_8, %c0_9] : memref<1x8x128xf32, #tpu.memory_space<vmem>>, vector<1x8x128xf32>
    %18 = vector.shape_cast %17 : vector<1x8x128xf32> to vector<8x128xf32>
    %19 = vector.shape_cast %16 : vector<16x128xf32> to vector<2x8x128xf32>
    %cst_10 = arith.constant dense<0.000000e+00> : vector<8x128xf32>
    %20 = vector.multi_reduction <add>, %19, %cst_10 [0] : vector<2x8x128xf32> to vector<8x128xf32>
    %21 = arith.addf %18, %20 : vector<8x128xf32>
    %c0_11 = arith.constant 0 : index
    %c0_12 = arith.constant 0 : index
    %c0_13 = arith.constant 0 : index
    %22 = vector.load %arg5[%c0_11, %c0_12, %c0_13] : memref<1x8x128xf32, #tpu.memory_space<vmem>>, vector<1x8x128xf32>
    %23 = vector.shape_cast %22 : vector<1x8x128xf32> to vector<8x128xf32>
    %24 = vector.shape_cast %21 : vector<8x128xf32> to vector<1x8x128xf32>
    tpu.vector_store %arg5[%c0_11, %c0_12, %c0_13], %24 {strides = array<i32>} : memref<1x8x128xf32, #tpu.memory_space<vmem>>, vector<1x8x128xf32>,
    return
  }
  func.func @transform_0(%arg0: i32, %arg1: i32) -> (i32, i32) {
    %c1_i32 = arith.constant 1 : i32
    %0 = arith.muli %arg0, %c1_i32 : i32
    %1 = arith.addi %0, %arg1 : i32
    %c0_i32 = arith.constant 0 : i32
    %c0_i32_0 = arith.constant 0 : i32
    return %1, %c0_i32 : i32, i32
  }
  func.func @transform_1(%arg0: i32, %arg1: i32) -> (i32, i32) {
    %c1_i32 = arith.constant 1 : i32
    %0 = arith.muli %arg0, %c1_i32 : i32
    %1 = arith.addi %0, %arg1 : i32
    %c0_i32 = arith.constant 0 : i32
    %c0_i32_0 = arith.constant 0 : i32
    return %1, %c0_i32 : i32, i32
  }
  func.func @transform_2(%arg0: i32, %arg1: i32) -> (i32, i32) {
    %c1_i32 = arith.constant 1 : i32
    %0 = arith.muli %arg0, %c1_i32 : i32
    %1 = arith.addi %0, %arg1 : i32
    %c0_i32 = arith.constant 0 : i32
    %c0_i32_0 = arith.constant 0 : i32
    return %1, %c0_i32 : i32, i32
  }
  func.func @transform_3(%arg0: i32, %arg1: i32) -> (i32, i32, i32) {
    %c0_i32 = arith.constant 0 : i32
    %c0_i32_0 = arith.constant 0 : i32
    %c0_i32_1 = arith.constant 0 : i32
    return %arg0, %c0_i32, %c0_i32_0 : i32, i32, i32
  }
}

</mosaic_0001>

<bundles_post_ra>
// kernel: tpu_custom_call.1
= control target key start
LH: loop header
LB: loop body
LE: loop exit
PB: predicated region body
PF: predicated region fallthrough
CT: control target
= control target key end

     0   :  { %8 = vsyncpa [#allocation3], 0  ;;  %s280_s0 = inlined_call_operand.hbm [shape: f32[16,128], index: 0, kind: input, shape index: {}]   ;;  %s281_s1 = inlined_call_operand.hbm [shape: f32[16,128], index: 1, kind: input, shape index: {}]   ;;  %s282_s2 = inlined_call_operand.hbm [shape: f32[16,128], index: 2, kind: input, shape index: {}]   ;;  %s283_s3 = inlined_call_operand.hbm [shape: f32[1,8,128], index: 3, kind: output, shape index: {}]  }
   0x1   :  { %9 = vsyncpa [#allocation6], 0 }
   0x2   :  { %10 = vsyncpa [#allocation4], 0  ;;  %s242_s12 = smov [#allocation5]   ;;  %s243_s14 = smov [#allocation2]  }
   0x3   :  { %s36_s13 = sshll.u32 %s242_s12, 4  ;;  %s20_s15 = sshll.u32 %s243_s14, 4  ;;  %s37_s13 = int_to_ptr.vmem [resolvable:$true] %s36_s13  ;;  %s21_s15 = int_to_ptr.vmem [resolvable:$true] %s20_s15 }
   0x4   :  { %s164_s16 = scalar_lea.vmem %s37_s13, 256  ;;  %p169_p1 = scmp.lt.s32.totalorder %s37_s13, %s37_s13 }
   0x5   :  { %p165_p0 = scmp.ne.s32.totalorder %s37_s13, %s164_s16  ;;  %p170_p2 = scmp.lt.s32.totalorder %s164_s16, %s164_s16 }
   0x7   :  { %p171_p3 = por %p170_p2, %p169_p1 }
   0x9   :  { %p172_p4 = pnand %p171_p3, %p165_p0 }
   0xb   :  { %175 = shalt.err (!%p172_p4)
}
   0xc   :  { %s244_s17 = smov 128   ;;  %s245_s18 = smov 8  }
   0xd   :  { %42 = dma.hbm_to_vmem [thread:$0]  %s281_s1, 256, %s37_s13, [#allocation6], %s244_s17, %s244_s17, %s245_s18  }
   0xe   :  { %s184_s21 = scalar_lea.vmem %s21_s15, 256  ;;  %p189_p6 = scmp.lt.s32.totalorder %s21_s15, %s21_s15 }
   0xf   :  { %p185_p5 = scmp.ne.s32.totalorder %s21_s15, %s184_s21  ;;  %p190_p7 = scmp.lt.s32.totalorder %s184_s21, %s184_s21 }
  0x11   :  { %p191_p8 = por %p190_p7, %p189_p6 }
  0x13   :  { %p192_p9 = pnand %p191_p8, %p185_p5 }
  0x15   :  { %195 = shalt.err (!%p192_p9)
}
  0x16   :  { %26 = dma.hbm_to_vmem [thread:$0]  %s280_s0, 256, %s21_s15, [#allocation3], %s244_s17, %s244_s17, %s245_s18  }
  0x17   :  { %s246_s24 = smov [#allocation7]  }
  0x18   :  { %s52_s25 = sshll.u32 %s246_s24, 4  ;;  %s53_s25 = int_to_ptr.vmem [resolvable:$true] %s52_s25 }
  0x19   :  { %s204_s26 = scalar_lea.vmem %s53_s25, 256  ;;  %p209_p11 = scmp.lt.s32.totalorder %s53_s25, %s53_s25 }
  0x1a   :  { %p205_p10 = scmp.ne.s32.totalorder %s53_s25, %s204_s26  ;;  %p210_p12 = scmp.lt.s32.totalorder %s204_s26, %s204_s26 }
  0x1c   :  { %p211_p13 = por %p210_p12, %p209_p11 }
  0x1e   :  { %p212_p0 = pnand %p211_p13, %p205_p10 }
  0x20   :  { %215 = shalt.err (!%p212_p0)
}
  0x21   :  { %58 = dma.hbm_to_vmem [thread:$0]  %s282_s2, 256, %s53_s25, [#allocation6], %s244_s17, %s244_s17, %s245_s18  }
  0x22   :  { %236 = dma.done.wait [#allocation3], 256  }
  0x23   :  { %237 = vsyncadd [#allocation3], 4294967040 }
  0x24   :  { %238 = dma.done.wait [#allocation6], 512  }
  0x25   :  { %239 = vsyncadd [#allocation6], 4294966784  ;;  %v79_v0 = vld [vmem:[#allocation5] sm:$0xff]  ;;  %v80_v1 = vld [vmem:[#allocation5 + $0x8] sm:$0xff]  ;;  %s247_s0 = smov [#allocation8]  }
  0x26   :  { %v91_v2 = vand.u32 2147483647, %v79_v0  ;;  %v92_v3 = vand.u32 2147483647, %v80_v1  ;;  %v81_v14 = vld [vmem:[#allocation2] sm:$0xff]  ;;  %v82_v15 = vld [vmem:[#allocation2 + $0x8] sm:$0xff] }
  0x27   :  { %v85_v17 = vmax.f32 %v79_v0, 0.0  ;;  %v87_v18 = vmul.f32 %v81_v14, %v79_v0  ;;  %v86_v21 = vmax.f32 %v80_v1, 0.0  ;;  %v88_v22 = vmul.f32 %v82_v15, %v80_v1  ;;  %v83_v32 = vld [vmem:[#allocation7] sm:$0xff]  ;;  %v84_v34 = vld [vmem:[#allocation7 + $0x8] sm:$0xff]  ;;  %s131_s2 = sshll.u32 %s247_s0, 4  ;;  %s132_s2 = int_to_ptr.vmem [resolvable:$true] %s131_s2 }
  0x28   :  { %v93_v4 = vsub.f32 0.0, %v91_v2  ;;  %v94_v5 = vsub.f32 0.0, %v92_v3  ;;  %s216_s28 = scalar_lea.vmem %s132_s2, 128  ;;  %p221_p2 = scmp.lt.s32.totalorder %s132_s2, %s132_s2 }
  0x29   :  { %v89_v26 = vsub.f32 %v85_v17, %v87_v18  ;;  %v90_v29 = vsub.f32 %v86_v21, %v88_v22  ;;  %p217_p1 = scmp.ne.s32.totalorder %s132_s2, %s216_s28  ;;  %p222_p3 = scmp.lt.s32.totalorder %s216_s28, %s216_s28 }
  0x2a   :  { %v95_v6 = vmul.f32 1.442695, %v93_v4  ;;  %v97_v7 = vmul.f32 1.442695, %v94_v5 }
  0x2b   :  { %p223_p4 = por %p222_p3, %p221_p2 }
  0x2c   :  { %148 = vpow2.f32 %v95_v6 }
  0x2d   :  { %150 = vpow2.f32 %v97_v7  ;;  %p224_p5 = pnand %p223_p4, %p217_p1 }
  0x39   :  { %v149_v8 = vpop.eup %148 }
  0x3a   :  { %v151_v9 = vpop.eup %150  ;;  %v99_v10 = vadd.f32 1.0, %v149_v8  ;;  %v102_v12 = vmul.f32 -0.5, %v149_v8  ;;  %v105_v19 = vand.u32 2147483647, %v149_v8 }
  0x3b   :  { %v108_v11 = vadd.f32 1.0, %v151_v9  ;;  %v111_v13 = vmul.f32 -0.5, %v151_v9  ;;  %v114_v23 = vand.u32 2147483647, %v151_v9 }
  0x3c   :  { %152 = vlog2.f32 %v99_v10  ;;  %v103_v16 = vadd.f32 1.0, %v102_v12  ;;  %vm106_vm0 = vcmp.lt.f32.partialorder %v105_v19, 0.0004427343 }
  0x3d   :  { %154 = vlog2.f32 %v108_v11  ;;  %v112_v20 = vadd.f32 1.0, %v111_v13  ;;  %vm115_vm1 = vcmp.lt.f32.partialorder %v114_v23, 0.0004427343 }
  0x3e   :  { %v104_v24 = vmul.f32 %v149_v8, %v103_v16 }
  0x3f   :  { %v113_v27 = vmul.f32 %v151_v9, %v112_v20 }
  0x49   :  { %v153_v25 = vpop.eup %152 }
  0x4a   :  { %v155_v28 = vpop.eup %154  ;;  %v101_v30 = vmul.f32 0.6931472, %v153_v25 }
  0x4b   :  { %v110_v31 = vmul.f32 0.6931472, %v155_v28 }
  0x4c   :  { %v107_v33 = vsel %vm106_vm0, %v104_v24, %v101_v30 }
  0x4d   :  { %v116_v35 = vsel %vm115_vm1, %v113_v27, %v110_v31  ;;  %v117_v36 = vadd.f32 %v107_v33, %v89_v26 }
  0x4e   :  { %v118_v37 = vadd.f32 %v116_v35, %v90_v29 }
  0x4f   :  { %v119_v38 = vmul.f32 %v117_v36, %v83_v32 }
  0x50   :  { %v120_v39 = vmul.f32 %v118_v37, %v84_v34 }
  0x52   :  { %v122_v40 = vadd.f32 %v120_v39, %v119_v38 }
  0x54   :  { %124 = vst [vmem:[#allocation8] sm:$0xff] %v122_v40 }
  0x55   :  { %227 = shalt.err (!%p224_p5)
}
  0x56   :  { %134 = dma.vmem_to_hbm [thread:$0]  %s132_s2, 128, %s283_s3, [#allocation4]  }
  0x57   :  { %240 = dma.done.wait [#allocation4], 128  }
  0x58   :  { %241 = vsyncadd [#allocation4], 4294967168 }
  0x59   :  { %138 = vsyncpa [#allocation3], 1 }
  0x5a   :  { %139 = vsyncpa [#allocation6], 1 }
  0x5b   :  { %140 = vsyncpa [#allocation4], 1 }

</bundles_post_ra>
